<compile_context>
chip_gen: v5e
topology: v5e:2x2
jax: 0.10.0
libtpu: 0.0.40
codegen_flags: <defaults>
</compile_context>

<pallas_src>
import functools

import jax
import jax.numpy as jnp
from jax.experimental import pallas as pl
from jax.experimental.pallas import tpu as pltpu


def _round_up(x, m):
    return ((x + m - 1) // m) * m


# --------------------------------------------------------------------------
# Path 1: whole vocab in one block (weight fully VMEM-resident).
# --------------------------------------------------------------------------
def _gen_kernel_full_v(x_ref, w_ref, b_ref, out_ref):
    # x_ref: (T, D) bf16   w_ref: (D, Vp) bf16 (resident)   b_ref: (1, Vp) f32
    logits = jnp.dot(x_ref[...], w_ref[...],
                     preferred_element_type=jnp.float32) + b_ref[...]
    m = jnp.max(logits, axis=-1, keepdims=True)
    e = jnp.exp(logits - m)
    s = jnp.sum(e, axis=-1, keepdims=True)
    inv = pl.reciprocal(s, approx=True)          # EUP; own VLIW slot
    out_ref[...] = (e * inv).astype(out_ref.dtype)


# --------------------------------------------------------------------------
# Path 2: vocab-tiled, two-pass online softmax (bounded VMEM at any vocab).
# Grid: (token_tiles, 2 passes, vocab_tiles); pass 0 = stats, pass 1 = write.
# --------------------------------------------------------------------------
def _gen_kernel_tiled_v(x_ref, w_ref, b_ref, out_ref, m_ref, l_ref):
    p = pl.program_id(1)
    v = pl.program_id(2)

    @pl.when(jnp.logical_and(p == 0, v == 0))
    def _():
        m_ref[...] = jnp.full_like(m_ref, -jnp.inf)
        l_ref[...] = jnp.zeros_like(l_ref)

    logits = jnp.dot(x_ref[...], w_ref[...],
                     preferred_element_type=jnp.float32) + b_ref[...]

    @pl.when(p == 0)
    def _():
        m_prev = m_ref[...]
        m_new = jnp.maximum(m_prev, jnp.max(logits, axis=-1, keepdims=True))
        l_ref[...] = (l_ref[...] * jnp.exp(m_prev - m_new)
                      + jnp.sum(jnp.exp(logits - m_new), axis=-1, keepdims=True))
        m_ref[...] = m_new

    @pl.when(p == 1)
    def _():
        inv = pl.reciprocal(l_ref[...], approx=True)
        out_ref[...] = (jnp.exp(logits - m_ref[...]) * inv).astype(out_ref.dtype)


# --------------------------------------------------------------------------
# One-time parameter prep (hoisted out of the per-call path).
# --------------------------------------------------------------------------
def make_generator_params(weight, bias):
    """weight: (vocab, dim_model); bias: (vocab,).

    Returns (w_t, b): weight pre-transposed to (dim_model, vocab) and cast to
    bf16 for the MXU, bias in f32. Done once, not per forward call.
    """
    w_t = jnp.asarray(weight).T.astype(jnp.bfloat16)
    b = jnp.asarray(bias).astype(jnp.float32)
    return w_t, b


# --------------------------------------------------------------------------
# Forward wrapper.
# --------------------------------------------------------------------------
@functools.partial(
    jax.jit,
    static_argnames=("block_tokens", "vocab_block", "out_dtype",
                     "force_vocab_tiling"))
def generator_forward(x, w_t, bias, *, block_tokens=256, vocab_block=2048,
                      out_dtype=None, force_vocab_tiling=False):
    """softmax(x @ w_t + bias, axis=-1).

    x: (..., dim_model) f32; w_t: (dim_model, vocab) (pre-transposed, bf16 or
    f32); bias: (vocab,) f32. Returns (..., vocab) in out_dtype (default f32).
    """
    lead = x.shape[:-1]
    D = x.shape[-1]
    Dw, V = w_t.shape
    assert D == Dw, "dim_model mismatch between x and weight"
    N = 1
    for s in lead:
        N *= s

    out_dtype = out_dtype or jnp.float32
    out_bytes = jnp.dtype(out_dtype).itemsize

    # --- token tiling (multiple of 8 sublanes; >=2 steps for megacore) ---
    T = max(8, min(block_tokens, _round_up(N, 8)))
    if _round_up(N, T) // T < 2 and N > 8:
        T = _round_up((N + 1) // 2, 8)
    N_pad = _round_up(N, T)

    # --- vocab padding & path selection ---
    Vp128 = _round_up(V, 128)
    small_path_bytes = (D * Vp128 * 2           # resident bf16 weight (1 buf)
                        + Vp128 * 4             # resident f32 bias  (1 buf)
                        + 2 * T * D * 2         # x tiles (bf16, double-buf)
                        + 2 * T * Vp128 * out_bytes)  # out tiles (double-buf)
    use_tiling = force_vocab_tiling or small_path_bytes > 40 * 2**20

    if use_tiling:
        TV = min(_round_up(vocab_block, 128), Vp128)
        Vp = _round_up(V, TV)
    else:
        TV = Vp128
        Vp = Vp128

    # --- input prep (pads are cheap; transpose/cast already hoisted) ---
    x2 = x.reshape(N, D).astype(jnp.bfloat16)
    if N_pad != N:
        x2 = jnp.pad(x2, ((0, N_pad - N), (0, 0)))
    w2 = w_t.astype(jnp.bfloat16)
    b2 = bias.astype(jnp.float32)
    if Vp != V:
        w2 = jnp.pad(w2, ((0, 0), (0, Vp - V)))
        # Large negative bias -> padded columns get ~0 probability mass.
        b2 = jnp.pad(b2, (0, Vp - V), constant_values=-1e30)
    b2 = b2.reshape(1, Vp)

    if not use_tiling:
        vmem_limit = min(64 * 2**20, int(small_path_bytes) + 16 * 2**20)
        out = pl.pallas_call(
            _gen_kernel_full_v,
            out_shape=jax.ShapeDtypeStruct((N_pad, Vp), out_dtype),
            grid_spec=pltpu.PrefetchScalarGridSpec(
                num_scalar_prefetch=0,
                grid=(N_pad // T,),
                in_specs=[
                    pl.BlockSpec((T, D), lambda i: (i, 0)),
                    # Constant block index -> VMEM-resident; no double buffer.
                    pl.BlockSpec((D, Vp), lambda i: (0, 0),
                                 pipeline_mode=pl.Buffered(1)),
                    pl.BlockSpec((1, Vp), lambda i: (0, 0),
                                 pipeline_mode=pl.Buffered(1)),
                ],
                out_specs=pl.BlockSpec((T, Vp), lambda i: (i, 0)),
            ),
            compiler_params=pltpu.CompilerParams(
                dimension_semantics=("parallel",),
                vmem_limit_bytes=vmem_limit),
        )(x2, w2, b2)
    else:
        nv = Vp // TV
        tiled_bytes = (2 * T * D * 2            # x tiles
                       + 2 * D * TV * 2         # streamed weight blocks
                       + 2 * TV * 4             # streamed bias blocks
                       + 2 * T * TV * out_bytes  # out tiles
                       + 2 * T * 4 * 2)         # m / l scratch
        vmem_limit = min(64 * 2**20, int(tiled_bytes) + 16 * 2**20)
        out = pl.pallas_call(
            _gen_kernel_tiled_v,
            out_shape=jax.ShapeDtypeStruct((N_pad, Vp), out_dtype),
            grid_spec=pltpu.PrefetchScalarGridSpec(
                num_scalar_prefetch=0,
                grid=(N_pad // T, 2, nv),
                in_specs=[
                    pl.BlockSpec((T, D), lambda i, p, v: (i, 0)),
                    pl.BlockSpec((D, TV), lambda i, p, v: (0, v)),
                    pl.BlockSpec((1, TV), lambda i, p, v: (0, v)),
                ],
                out_specs=pl.BlockSpec((T, TV), lambda i, p, v: (i, v)),
                scratch_shapes=[pltpu.VMEM((T, 1), jnp.float32),
                                pltpu.VMEM((T, 1), jnp.float32)],
            ),
            compiler_params=pltpu.CompilerParams(
                dimension_semantics=("parallel", "arbitrary", "arbitrary"),
                vmem_limit_bytes=vmem_limit),
        )(x2, w2, b2)

    return out[:N, :V].reshape(*lead, V)


if __name__ == "__main__":
    # Small, deterministic setup consistent with the module's __init__ shapes.
    dim_model = 128
    vocab = 500          # deliberately NOT a multiple of 128 (exercises V padding)
    B, S = 2, 8

    key = jax.random.PRNGKey(0)
    k_x, k_w, k_b = jax.random.split(key, 3)
    x = jax.random.normal(k_x, (B, S, dim_model), dtype=jnp.float32)
    weight = 0.05 * jax.random.normal(k_w, (vocab, dim_model), dtype=jnp.float32)
    bias = 0.05 * jax.random.normal(k_b, (vocab,), dtype=jnp.float32)

    # One-time prep (transpose + bf16 cast hoisted out of the forward path).
    w_t, b = make_generator_params(weight, bias)

    # f32 reference with the same semantics as the PyTorch module.
    ref = jax.nn.softmax(jnp.einsum("bsd,vd->bsv", x, weight) + bias, axis=-1)

    # Path 1: small-vocab path (weight fully VMEM-resident).
    out = jax.block_until_ready(generator_forward(x, w_t, b))
    assert out.shape == (B, S, vocab)
    assert jnp.allclose(jnp.sum(out, axis=-1), 1.0, atol=5e-3)
    assert jnp.allclose(out, ref, atol=2e-3, rtol=3e-2), "mismatch (full-V path)"

    # Path 2: vocab-tiled two-pass online-softmax path (large-vocab / v7x path),
    # forced here with a small vocab block so both code paths are exercised.
    out_t = jax.block_until_ready(
        generator_forward(x, w_t, b, vocab_block=128, force_vocab_tiling=True))
    assert out_t.shape == (B, S, vocab)
    assert jnp.allclose(jnp.sum(out_t, axis=-1), 1.0, atol=5e-3)
    assert jnp.allclose(out_t, ref, atol=2e-3, rtol=3e-2), "mismatch (tiled path)"

    print("KERNEL_OK")
</pallas_src>

<mosaic_0001>
module attributes {stable_mosaic.version = 11 : i64} {
  func.func @_gen_kernel_full_v(%arg0: i32, %arg1: memref<8x128xbf16, #tpu.memory_space<vmem>>, %arg2: memref<128x512xbf16, #tpu.memory_space<vmem>>, %arg3: memref<1x512xf32, #tpu.memory_space<vmem>>, %arg4: memref<8x512xf32, #tpu.memory_space<vmem>>) attributes {dimension_semantics = [#tpu.dimension_semantics<parallel>], iteration_bounds = array<i64: 2>, scalar_prefetch = 0 : i64, scratch_operands = 0 : i64, tpu.core_type = #tpu.core_type<tc>, window_params = [{transform_indices = @transform_0, window_bounds = array<i64: 8, 128>}, {pipeline_mode = #tpu.pipeline_mode<synchronous>, transform_indices = @transform_1, window_bounds = array<i64: 128, 512>}, {pipeline_mode = #tpu.pipeline_mode<synchronous>, transform_indices = @transform_2, window_bounds = array<i64: 1, 512>}, {transform_indices = @transform_3, window_bounds = array<i64: 8, 512>}]} {
    %c0 = arith.constant 0 : index
    %c0_0 = arith.constant 0 : index
    %0 = vector.load %arg1[%c0, %c0_0] : memref<8x128xbf16, #tpu.memory_space<vmem>>, vector<8x128xbf16>
    %c0_1 = arith.constant 0 : index
    %c0_2 = arith.constant 0 : index
    %1 = vector.load %arg2[%c0_1, %c0_2] : memref<128x512xbf16, #tpu.memory_space<vmem>>, vector<128x512xbf16>
    %cst = arith.constant dense<0.000000e+00> : vector<8x512xf32>
    %2 = tpu.matmul %0, %1, %cst {dimension_numbers = #tpu.dot_dimension_numbers<[1], [0], [0], [1], [0, 0, 1, 1], [], []>} : vector<8x128xbf16>, vector<128x512xbf16>, vector<8x512xf32> -> vector<8x512xf32>
    %c0_3 = arith.constant 0 : index
    %c0_4 = arith.constant 0 : index
    %3 = vector.load %arg3[%c0_3, %c0_4] : memref<1x512xf32, #tpu.memory_space<vmem>>, vector<1x512xf32>
    %4 = vector.broadcast %3 : vector<1x512xf32> to vector<8x512xf32>
    %5 = arith.addf %2, %4 : vector<8x512xf32>
    %cst_5 = arith.constant dense<0xFF800000> : vector<8xf32>
    %6 = vector.multi_reduction <maximumf>, %5, %cst_5 [1] : vector<8x512xf32> to vector<8xf32>
    %7 = vector.shape_cast %6 : vector<8xf32> to vector<8x1xf32>
    %8 = vector.broadcast %7 : vector<8x1xf32> to vector<8x512xf32>
    %9 = arith.subf %5, %8 : vector<8x512xf32>
    %10 = math.exp %9 : vector<8x512xf32>
    %cst_6 = arith.constant dense<0.000000e+00> : vector<8xf32>
    %11 = vector.multi_reduction <add>, %10, %cst_6 [1] : vector<8x512xf32> to vector<8xf32>
    %12 = vector.shape_cast %11 : vector<8xf32> to vector<8x1xf32>
    %13 = tpu.reciprocal %12 {approx = true} : vector<8x1xf32> -> vector<8x1xf32>
    %14 = vector.broadcast %13 : vector<8x1xf32> to vector<8x512xf32>
    %15 = arith.mulf %10, %14 : vector<8x512xf32>
    %c0_7 = arith.constant 0 : index
    %c0_8 = arith.constant 0 : index
    %16 = vector.load %arg4[%c0_7, %c0_8] : memref<8x512xf32, #tpu.memory_space<vmem>>, vector<8x512xf32>
    tpu.vector_store %arg4[%c0_7, %c0_8], %15 {strides = array<i32>} : memref<8x512xf32, #tpu.memory_space<vmem>>, vector<8x512xf32>,
    return
  }
  func.func @transform_0(%arg0: i32) -> (i32, i32) {
    %c0_i32 = arith.constant 0 : i32
    %c0_i32_0 = arith.constant 0 : i32
    return %arg0, %c0_i32 : i32, i32
  }
  func.func @transform_1(%arg0: i32) -> (i32, i32) {
    %c0_i32 = arith.constant 0 : i32
    %c0_i32_0 = arith.constant 0 : i32
    %c0_i32_1 = arith.constant 0 : i32
    return %c0_i32, %c0_i32_0 : i32, i32
  }
  func.func @transform_2(%arg0: i32) -> (i32, i32) {
    %c0_i32 = arith.constant 0 : i32
    %c0_i32_0 = arith.constant 0 : i32
    %c0_i32_1 = arith.constant 0 : i32
    return %c0_i32, %c0_i32_0 : i32, i32
  }
  func.func @transform_3(%arg0: i32) -> (i32, i32) {
    %c0_i32 = arith.constant 0 : i32
    %c0_i32_0 = arith.constant 0 : i32
    return %arg0, %c0_i32 : i32, i32
  }
}

</mosaic_0001>

<bundles_post_ra>
// kernel: generator_forward.1
= control target key start
LH: loop header
LB: loop body
LE: loop exit
PB: predicated region body
PF: predicated region fallthrough
CT: control target
= control target key end

     0   :  { %s726_s12 = smov 0   ;;  %s946_s0 = inlined_call_operand.vmem [shape: bf16[16,128], index: 0, kind: input, shape index: {}]   ;;  %s947_s1 = inlined_call_operand.vmem [shape: bf16[128,512], index: 1, kind: input, shape index: {}]   ;;  %s948_s2 = inlined_call_operand.vmem [shape: f32[1,512], index: 2, kind: input, shape index: {}]   ;;  %s949_s3 = inlined_call_operand.vmem [shape: f32[16,512], index: 3, kind: output, shape index: {}]  }
   0x1 LB: > { %s509_s13 = sadd.s32 4294967295, %s704_s12   ;;  %p513_p0 = scmp.ge.s32.totalorder %s704_s12, 1  ;;  %s704_s12 = sphi %s726_s12, %s13_s12  }
   0x2   : > { %p136_p1 = scmp.lt.s32.totalorder %s704_s12, 3 }
   0x4   : > { %p137_p2 = pnand %p513_p0, %p136_p1 }
   0x5   : > { %p159_p3 = scmp.lt.s32.totalorder (!%p137_p2), %s509_s13, 1 }
   0x6   : > { %140 = sbr.rel (%p137_p2) target bundleno = 448 (0x1c0), region = 32 }
   0xb   : > { %v631_v0 = vld [vmem:[%s947_s1 + $0xe0] sm:$0xf]  ;;  %v678_v1 = vld [vmem:[%s947_s1 + $0xec] sm:$0xf0]  ;;  %v676_v2 = vld [vmem:[%s947_s1 + $0xe4] sm:$0xf] }
   0xc   : > { %v632_v3 = vor.u32 %v678_v1, %v631_v0  ;;  %v633_v4 = vld [vmem:[%s947_s1 + $0xf0] sm:$0xf0]  ;;  %v639_v5 = vld [vmem:[%s947_s1 + $0xe8] sm:$0xf]  ;;  %v679_v6 = vld [vmem:[%s947_s1 + $0xf4] sm:$0xf0] }
   0xd   : > { %v636_v7 = vor.u32 %v676_v2, %v633_v4  ;;  %v640_v8 = vor.u32 %v679_v6, %v639_v5  ;;  %v677_v9 = vld [vmem:[%s947_s1 + $0xec] sm:$0xf]  ;;  %v641_v10 = vld [vmem:[%s947_s1 + $0xf8] sm:$0xf0]  ;;  %v615_v11 = vld [vmem:[%s947_s1 + $0xc0] sm:$0xf] }
   0xe   : > { %371 = vmatpush.bf16.msra.mxu0 %v632_v3  ;;  %v644_v12 = vor.u32 %v677_v9, %v641_v10  ;;  %v674_v13 = vld [vmem:[%s947_s1 + $0xcc] sm:$0xf0]  ;;  %v672_v14 = vld [vmem:[%s947_s1 + $0xc4] sm:$0xf]  ;;  %v617_v15 = vld [vmem:[%s947_s1 + $0xd0] sm:$0xf0] }
   0xf   : > { %384 = vmatpush.bf16.msra.mxu1 %v636_v7  ;;  %397 = vmatpush.bf16.msra.mxu2 %v640_v8  ;;  %v616_v16 = vor.u32 %v674_v13, %v615_v11  ;;  %v620_v17 = vor.u32 %v672_v14, %v617_v15  ;;  %v623_v18 = vld [vmem:[%s947_s1 + $0xc8] sm:$0xf]  ;;  %v675_v19 = vld [vmem:[%s947_s1 + $0xd4] sm:$0xf0]  ;;  %v673_v20 = vld [vmem:[%s947_s1 + $0xcc] sm:$0xf] }
  0x10   : > { %410 = vmatpush.bf16.msra.mxu3 %v644_v12  ;;  %v624_v21 = vor.u32 %v675_v19, %v623_v18  ;;  %v625_v22 = vld [vmem:[%s947_s1 + $0xd8] sm:$0xf0]  ;;  %v599_v23 = vld [vmem:[%s947_s1 + $0xa0] sm:$0xf]  ;;  %v670_v24 = vld [vmem:[%s947_s1 + $0xac] sm:$0xf0] }
  0x11   : > { %v628_v25 = vor.u32 %v673_v20, %v625_v22  ;;  %v668_v26 = vld [vmem:[%s947_s1 + $0xa4] sm:$0xf]  ;;  %v601_v27 = vld [vmem:[%s947_s1 + $0xb0] sm:$0xf0]  ;;  %v607_v28 = vld [vmem:[%s947_s1 + $0xa8] sm:$0xf]  ;;  %v600_v29 = vor.u32 %v670_v24, %v599_v23 }
  0x12   : > { %372 = vmatpush.bf16.msra.mxu0 %v616_v16  ;;  %v671_v30 = vld [vmem:[%s947_s1 + $0xb4] sm:$0xf0]  ;;  %v669_v31 = vld [vmem:[%s947_s1 + $0xac] sm:$0xf]  ;;  %v609_v32 = vld [vmem:[%s947_s1 + $0xb8] sm:$0xf0]  ;;  %v604_v33 = vor.u32 %v668_v26, %v601_v27 }
  0x13   : > { %385 = vmatpush.bf16.msra.mxu1 %v620_v17  ;;  %398 = vmatpush.bf16.msra.mxu2 %v624_v21  ;;  %v608_v34 = vor.u32 %v671_v30, %v607_v28  ;;  %v583_v35 = vld [vmem:[%s947_s1 + $0x80] sm:$0xf]  ;;  %v666_v36 = vld [vmem:[%s947_s1 + $0x8c] sm:$0xf0]  ;;  %v664_v37 = vld [vmem:[%s947_s1 + $0x84] sm:$0xf]  ;;  %v612_v38 = vor.u32 %v669_v31, %v609_v32 }
  0x14   : > { %411 = vmatpush.bf16.msra.mxu3 %v628_v25  ;;  %v585_v39 = vld [vmem:[%s947_s1 + $0x90] sm:$0xf0]  ;;  %v591_v40 = vld [vmem:[%s947_s1 + $0x88] sm:$0xf]  ;;  %v667_v41 = vld [vmem:[%s947_s1 + $0x94] sm:$0xf0]  ;;  %v584_v44 = vor.u32 %v666_v36, %v583_v35 }
  0x15   : > { %v665_v42 = vld [vmem:[%s947_s1 + $0x8c] sm:$0xf]  ;;  %v593_v43 = vld [vmem:[%s947_s1 + $0x98] sm:$0xf0]  ;;  %v588_v45 = vor.u32 %v664_v37, %v585_v39  ;;  %v592_v46 = vor.u32 %v667_v41, %v591_v40  ;;  %v567_v47 = vld [vmem:[%s947_s1 + $0x60] sm:$0xf] }
  0x16   : > { %373 = vmatpush.bf16.msra.mxu0 %v600_v29  ;;  %v662_v48 = vld [vmem:[%s947_s1 + $0x6c] sm:$0xf0]  ;;  %v660_v49 = vld [vmem:[%s947_s1 + $0x64] sm:$0xf]  ;;  %v596_v50 = vor.u32 %v665_v42, %v593_v43  ;;  %v569_v51 = vld [vmem:[%s947_s1 + $0x70] sm:$0xf0] }
  0x17   : > { %386 = vmatpush.bf16.msra.mxu1 %v604_v33  ;;  %399 = vmatpush.bf16.msra.mxu2 %v608_v34  ;;  %v575_v52 = vld [vmem:[%s947_s1 + $0x68] sm:$0xf]  ;;  %v663_v53 = vld [vmem:[%s947_s1 + $0x74] sm:$0xf0]  ;;  %v661_v54 = vld [vmem:[%s947_s1 + $0x6c] sm:$0xf]  ;;  %v568_v56 = vor.u32 %v662_v48, %v567_v47  ;;  %v572_v57 = vor.u32 %v660_v49, %v569_v51 }
  0x18   : > { %412 = vmatpush.bf16.msra.mxu3 %v612_v38  ;;  %v577_v55 = vld [vmem:[%s947_s1 + $0x78] sm:$0xf0]  ;;  %v576_v58 = vor.u32 %v663_v53, %v575_v52  ;;  %v551_v59 = vld [vmem:[%s947_s1 + $0x40] sm:$0xf]  ;;  %v658_v60 = vld [vmem:[%s947_s1 + $0x4c] sm:$0xf0] }
  0x19   : > { %v656_v61 = vld [vmem:[%s947_s1 + $0x44] sm:$0xf]  ;;  %v580_v62 = vor.u32 %v661_v54, %v577_v55  ;;  %v553_v63 = vld [vmem:[%s947_s1 + $0x50] sm:$0xf0]  ;;  %v559_v0 = vld [vmem:[%s947_s1 + $0x48] sm:$0xf]  ;;  %v552_v4 = vor.u32 %v658_v60, %v551_v59 }
  0x1a   : > { %374 = vmatpush.bf16.msra.mxu0 %v584_v44  ;;  %v659_v1 = vld [vmem:[%s947_s1 + $0x54] sm:$0xf0]  ;;  %v657_v2 = vld [vmem:[%s947_s1 + $0x4c] sm:$0xf]  ;;  %v561_v3 = vld [vmem:[%s947_s1 + $0x58] sm:$0xf0]  ;;  %v556_v6 = vor.u32 %v656_v61, %v553_v63 }
  0x1b   : > { %387 = vmatpush.bf16.msra.mxu1 %v588_v45  ;;  %400 = vmatpush.bf16.msra.mxu2 %v592_v46  ;;  %v535_v5 = vld [vmem:[%s947_s1 + $0x20] sm:$0xf]  ;;  %v560_v7 = vor.u32 %v659_v1, %v559_v0  ;;  %v654_v8 = vld [vmem:[%s947_s1 + $0x2c] sm:$0xf0]  ;;  %v652_v9 = vld [vmem:[%s947_s1 + $0x24] sm:$0xf]  ;;  %v564_v11 = vor.u32 %v657_v2, %v561_v3 }
  0x1c   : > { %413 = vmatpush.bf16.msra.mxu3 %v596_v50  ;;  %v537_v10 = vld [vmem:[%s947_s1 + $0x30] sm:$0xf0]  ;;  %v543_v12 = vld [vmem:[%s947_s1 + $0x28] sm:$0xf]  ;;  %v655_v13 = vld [vmem:[%s947_s1 + $0x34] sm:$0xf0]  ;;  %v536_v16 = vor.u32 %v654_v8, %v535_v5 }
  0x1d   : > { %v653_v14 = vld [vmem:[%s947_s1 + $0x2c] sm:$0xf]  ;;  %v545_v15 = vld [vmem:[%s947_s1 + $0x38] sm:$0xf0]  ;;  %v519_v17 = vld [vmem:[%s947_s1] sm:$0xf]  ;;  %v540_v18 = vor.u32 %v652_v9, %v537_v10  ;;  %v544_v19 = vor.u32 %v655_v13, %v543_v12 }
  0x1e   : > { %375 = vmatpush.bf16.msra.mxu0 %v568_v56  ;;  %s951_s13 = smov (!%p159_p3, %s509_s13), 1  ;;  %v650_v20 = vld [vmem:[%s947_s1 + $0xc] sm:$0xf0]  ;;  %v648_v21 = vld [vmem:[%s947_s1 + $0x4] sm:$0xf]  ;;  %v548_v23 = vor.u32 %v653_v14, %v545_v15 }
  0x1f   : > { %388 = vmatpush.bf16.msra.mxu1 %v572_v57  ;;  %401 = vmatpush.bf16.msra.mxu2 %v576_v58  ;;  %v521_v22 = vld [vmem:[%s947_s1 + $0x10] sm:$0xf0]  ;;  %v527_v24 = vld [vmem:[%s947_s1 + $0x8] sm:$0xf]  ;;  %v651_v25 = vld [vmem:[%s947_s1 + $0x14] sm:$0xf0]  ;;  %v520_v28 = vor.u32 %v650_v20, %v519_v17 }
  0x20   : > { %414 = vmatpush.bf16.msra.mxu3 %v580_v62  ;;  %s514_s11 = sshll.u32 %s951_s13, 2  ;;  %v649_v26 = vld [vmem:[%s947_s1 + $0xc] sm:$0xf]  ;;  %v529_v27 = vld [vmem:[%s947_s1 + $0x18] sm:$0xf0]  ;;  %v524_v29 = vor.u32 %v648_v21, %v521_v22  ;;  %v528_v30 = vor.u32 %v651_v25, %v527_v24  ;;  %s647_s23 = sshll.u32 %s951_s13, 5 }
  0x21   : > { %s162_s20 = scalar_lea.vmem %s946_s0, %s514_s11  ;;  %v532_v31 = vor.u32 %v649_v26, %v529_v27  ;;  %v201_v33 = vld [vmem:[%s948_s2] sm:$0xf]  ;;  %s167_s26 = scalar_lea.vmem %s949_s3, %s647_s23 }
  0x22   : > { %376 = vmatpush.bf16.msra.mxu0 %v552_v4  ;;  %v168_v32 = vld [vmem:[%s162_s20] sm:$0xf]  ;;  %v203_v35 = vperm.slane %v201_v33, 0  ;;  %v204_v36 = vperm.slane %v201_v33, 1  ;;  %v205_v38 = vperm.slane %v201_v33, 2  ;;  %v206_v41 = vperm.slane %v201_v33, 3 }
  0x23   : > { %389 = vmatpush.bf16.msra.mxu1 %v556_v6  ;;  %402 = vmatpush.bf16.msra.mxu2 %v560_v7 }
  0x24   : > { %415 = vmatpush.bf16.msra.mxu3 %v564_v11 }
  0x26   : > { %377 = vmatpush.bf16.msra.mxu0 %v536_v16 }
  0x27   : > { %390 = vmatpush.bf16.msra.mxu1 %v540_v18  ;;  %403 = vmatpush.bf16.msra.mxu2 %v544_v19 }
  0x28   : > { %416 = vmatpush.bf16.msra.mxu3 %v548_v23 }
  0x2a   : > { %378 = vmatpush.bf16.msra.mxu0 %v520_v28 }
  0x2b   : > { %391 = vmatpush.bf16.msra.mxu1 %v524_v29  ;;  %404 = vmatpush.bf16.msra.mxu2 %v528_v30 }
  0x2c   : > { %417 = vmatpush.bf16.msra.mxu3 %v532_v31 }
  0x2d   : > { %379 = vmatmul.bf16.vlgmr.msra.gmra.mxu0 %v168_v32 }
  0x2e   : > { %392 = vmatmul.bf16.vlgmr.msra.gmra.mxu1 %v168_v32  ;;  %405 = vmatmul.bf16.vlgmr.msra.gmra.mxu2 %v168_v32 }
  0x2f   : > { %418 = vmatmul.bf16.vlgmr.msra.gmra.mxu3 %v168_v32 }
  0xaa   : > { %v380_v34 = vpop.f32.mrf.mxu0 }
  0xab   : > { %v393_v37 = vpop.f32.mrf.mxu1  ;;  %v381_v39 = vadd.f32 %v380_v34, %v203_v35 }
  0xac   : > { %v394_v40 = vadd.f32 %v393_v37, %v204_v36 }
  0xae   : > { %v423_v48 = vmax.f32 %v381_v39, %v394_v40 }
  0xb1   : > { %v406_v42 = vpop.f32.mrf.mxu2 }
  0xb2   : > { %v407_v43 = vadd.f32 %v406_v42, %v205_v38  ;;  %v419_v44 = vpop.f32.mrf.mxu3  ;;  %v382_v45 = vpop.f32.mrf.mxu0 }
  0xb3   : > { %v420_v46 = vadd.f32 %v419_v44, %v206_v41  ;;  %v395_v47 = vpop.f32.mrf.mxu1 }
  0xb5   : > { %v424_v49 = vmax.f32 %v407_v43, %v420_v46 }
  0xb7   : > { %v425_v50 = vmax.f32 %v423_v48, %v424_v49 }
  0xb9   : > { %426 = vmax.xlane.f32.xlu0 %v425_v50  ;;  %v408_v51 = vpop.f32.mrf.mxu2 }
  0xba   : > { %v421_v52 = vpop.f32.mrf.mxu3 }
 0x12c   : > { %v427_v53 = vpop.xlane.xlu0 %426 }
 0x12d   : > { %v428_v54 = vsub.f32 %v381_v39, %v427_v53  ;;  %v429_v55 = vsub.f32 %v394_v40, %v427_v53  ;;  %v430_v56 = vsub.f32 %v407_v43, %v427_v53  ;;  %v431_v57 = vsub.f32 %v420_v46, %v427_v53 }
 0x12f   : > { %v432_v58 = vmul.f32 1.442695, %v428_v54  ;;  %v434_v59 = vmul.f32 1.442695, %v429_v55  ;;  %v436_v60 = vmul.f32 1.442695, %v430_v56 }
 0x130   : > { %v438_v61 = vmul.f32 1.442695, %v431_v57 }
 0x131   : > { %688 = vpow2.f32 %v432_v58 }
 0x132   : > { %690 = vpow2.f32 %v434_v59 }
 0x133   : > { %692 = vpow2.f32 %v436_v60 }
 0x134   : > { %694 = vpow2.f32 %v438_v61 }
 0x137   : > { %v689_v62 = vpop.eup %688 }
 0x138   : > { %v691_v63 = vpop.eup %690 }
 0x139   : > { %v440_v0 = vadd.f32 %v691_v63, %v689_v62  ;;  %v693_v1 = vpop.eup %692 }
 0x13a   : > { %v695_v3 = vpop.eup %694 }
 0x13b   : > { %v441_v2 = vadd.f32 %v693_v1, %v440_v0 }
 0x13d   : > { %v442_v4 = vadd.f32 %v695_v3, %v441_v2 }
 0x13f   : > { %443 = vadd.xlane.f32.xlu0 %v442_v4 }
 0x1b2   : > { %v444_v5 = vpop.xlane.xlu0 %443 }
 0x1b3   : > { %696 = vrcp.f32 %v444_v5 }
 0x1b9   : > { %v697_v6 = vpop.eup %696 }
 0x1ba   : > { %v446_v7 = vmul.f32 %v697_v6, %v689_v62  ;;  %v447_v8 = vmul.f32 %v697_v6, %v691_v63  ;;  %v448_v9 = vmul.f32 %v697_v6, %v693_v1  ;;  %v449_v10 = vmul.f32 %v697_v6, %v695_v3 }
 0x1bc   : > { %450 = vst [vmem:[%s167_s26] sm:$0xff] %v446_v7 }
 0x1bd   : > { %451 = vst [vmem:[%s167_s26 + $0x8] sm:$0xff] %v447_v8 }
 0x1be   : > { %452 = vst [vmem:[%s167_s26 + $0x10] sm:$0xff] %v448_v9 }
 0x1bf   : > { %453 = vst [vmem:[%s167_s26 + $0x18] sm:$0xff] %v449_v10 }
 0x1c0 PF: > { %s13_s12 = sadd.s32 1, %s704_s12  }
 0x1c1   : > { %p10_p4 = scmp.ge.s32.totalorder %s13_s12, 4  }
 0x1c3   :  { %12 = sbr.rel (!%p10_p4) target bundleno = 1 (0x1), region = 62 }

</bundles_post_ra>
